<compile_context>
chip_gen: v7x
topology: tpu7x:2x2x1
jax: 0.10.0
libtpu: 0.0.40
codegen_flags: <defaults>
</compile_context>

<pallas_src>
import functools

import jax
import jax.numpy as jnp
from jax import lax
from jax.experimental import pallas as pl
from jax.experimental.pallas import tpu as pltpu


def _round_up(x, m):
    return ((x + m - 1) // m) * m


def _projection_head_kernel(x_ref, w1t_ref, b1_ref, w2t_ref, b2_ref, o_ref):
    # x_ref: (Cin, t_pix) tile -- channels on sublanes, spatial pixels on lanes.
    x = x_ref[...].astype(jnp.float32)

    # conv1 (1x1) with BN folded in, channels-first matmul: (Cin,Cin)@(Cin,t)
    h = jnp.dot(w1t_ref[...], x, preferred_element_type=jnp.float32)
    h = jnp.maximum(h + b1_ref[...], 0.0)                 # bias + ReLU

    # conv2 (1x1): (Cproj,Cin)@(Cin,t)
    y = jnp.dot(w2t_ref[...], h, preferred_element_type=jnp.float32)
    y = y + b2_ref[...]

    # F.normalize(p=2, dim=channel):  y / max(||y||, 1e-12)
    #   == y * rsqrt(max(sum(y^2), 1e-24))
    sumsq = jnp.sum(y * y, axis=0, keepdims=True)         # (1, t_pix)
    inv = lax.rsqrt(jnp.maximum(sumsq, 1e-24))
    o_ref[...] = (y * inv).astype(o_ref.dtype)


@functools.partial(jax.jit, static_argnames=("t_pix",))
def projection_head(x_nchw, w1, b1, bn_scale, bn_shift, w2, b2, t_pix=1024):
    """x_nchw: (N, Cin, H, W); returns (N, Cproj, H, W).

    w1: (Cin, Cin), w2: (Cin, Cproj) in 'x @ w' orientation (a 1x1 conv weight
    (Cout, Cin, 1, 1) is just its (Cin, Cout) channel matrix transposed).
    bn_scale/bn_shift are the eval-mode folded BN affine parameters.
    """
    N, Cin, H, W = x_nchw.shape
    Cproj = w2.shape[1]
    HW = H * W

    # --- constant-fold BN + conv1 bias into the first weight (done once) ---
    #   (x @ w1 + b1) * s + t  ==  x @ (w1 * s) + (b1 * s + t)
    w1_f = w1 * bn_scale[None, :]
    b1_f = b1 * bn_scale + bn_shift

    # Channels-first operands for the in-kernel left-multiplies.
    w1_t = jnp.transpose(w1_f)               # (Cin, Cin)   rows = out channel
    w2_t = jnp.transpose(w2)                 # (Cproj, Cin)
    b1_c = b1_f.reshape(Cin, 1)
    b2_c = b2.reshape(Cproj, 1)

    # NCHW-native: only a free reshape, no transpose / HBM round-trip.
    x3 = x_nchw.reshape(N, Cin, HW)

    # Lane-dense spatial tiling; pad H*W up to a tile multiple so any (N,H,W)
    # works.  Padded pixels are all-zero (normalize to zero) and sliced off.
    tile = min(_round_up(t_pix, 128), _round_up(HW, 128))
    hw_pad = _round_up(HW, tile)
    if hw_pad != HW:
        x3 = jnp.pad(x3, ((0, 0), (0, 0), (0, hw_pad - HW)))

    grid = (N, hw_pad // tile)
    param = lambda n, j: (0, 0)               # parameters: full block each step

    out3 = pl.pallas_call(
        _projection_head_kernel,
        out_shape=jax.ShapeDtypeStruct((N, Cproj, hw_pad), x_nchw.dtype),
        grid_spec=pltpu.PrefetchScalarGridSpec(
            num_scalar_prefetch=0,
            grid=grid,
            in_specs=[
                pl.BlockSpec((None, Cin, tile), lambda n, j: (n, 0, j)),  # x
                pl.BlockSpec((Cin, Cin), param),      # w1 (BN-folded, transposed)
                pl.BlockSpec((Cin, 1), param),        # b1 (BN-folded)
                pl.BlockSpec((Cproj, Cin), param),    # w2 (transposed)
                pl.BlockSpec((Cproj, 1), param),      # b2
            ],
            out_specs=pl.BlockSpec((None, Cproj, tile), lambda n, j: (n, 0, j)),
        ),
        compiler_params=pltpu.CompilerParams(
            dimension_semantics=("parallel", "parallel")),
    )(x3, w1_t, b1_c, w2_t, b2_c)

    if hw_pad != HW:
        out3 = out3[:, :, :HW]
    return out3.reshape(N, Cproj, H, W)


def _reference(x_nchw, w1, b1, bn_scale, bn_shift, w2, b2):
    x = jnp.transpose(x_nchw, (0, 2, 3, 1)).astype(jnp.float32)
    h = jnp.einsum("nhwc,cd->nhwd", x, w1) + b1
    h = jnp.maximum(h * bn_scale + bn_shift, 0.0)
    y = jnp.einsum("nhwc,cd->nhwd", h, w2) + b2
    n = jnp.maximum(jnp.sqrt(jnp.sum(y * y, axis=-1, keepdims=True)), 1e-12)
    return jnp.transpose(y / n, (0, 3, 1, 2))


if __name__ == "__main__":
    # Small shapes consistent with the module: batch=2, dim_in=4, 16x16, proj_dim=32.
    N, Cin, H, W = 2, 4, 16, 16
    Cproj = 32

    key = jax.random.PRNGKey(0)
    kx, kw1, kb1, kg, kb, km, kv, kw2, kb2 = jax.random.split(key, 9)

    x = jax.random.normal(kx, (N, Cin, H, W), dtype=jnp.float32)

    # Deterministic synthetic parameters (conv weights stored as (Cin, Cout)).
    w1 = jax.random.normal(kw1, (Cin, Cin), dtype=jnp.float32) * 0.2
    b1 = jax.random.normal(kb1, (Cin,), dtype=jnp.float32) * 0.1
    w2 = jax.random.normal(kw2, (Cin, Cproj), dtype=jnp.float32) * 0.2
    b2 = jax.random.normal(kb2, (Cproj,), dtype=jnp.float32) * 0.1

    # Synthetic BN (eval mode) folded into scale/shift.
    gamma = 1.0 + 0.1 * jax.random.normal(kg, (Cin,), dtype=jnp.float32)
    beta = 0.1 * jax.random.normal(kb, (Cin,), dtype=jnp.float32)
    running_mean = 0.1 * jax.random.normal(km, (Cin,), dtype=jnp.float32)
    running_var = jnp.abs(1.0 + 0.1 * jax.random.normal(kv, (Cin,), dtype=jnp.float32))
    eps = 1e-5
    bn_scale = gamma / jnp.sqrt(running_var + eps)
    bn_shift = beta - running_mean * bn_scale

    out = projection_head(x, w1, b1, bn_scale, bn_shift, w2, b2)
    out = jax.block_until_ready(out)

    ref = _reference(x, w1, b1, bn_scale, bn_shift, w2, b2)
    assert out.shape == (N, Cproj, H, W)
    assert jnp.allclose(out, ref, atol=1e-5, rtol=1e-5)

    print("KERNEL_OK")
</pallas_src>

<mosaic_0001>
module attributes {stable_mosaic.version = 11 : i64} {
  func.func @_projection_head_kernel(%arg0: i32, %arg1: i32, %arg2: memref<1x4x256xf32, #tpu.memory_space<vmem>>, %arg3: memref<4x4xf32, #tpu.memory_space<vmem>>, %arg4: memref<4x1xf32, #tpu.memory_space<vmem>>, %arg5: memref<32x4xf32, #tpu.memory_space<vmem>>, %arg6: memref<32x1xf32, #tpu.memory_space<vmem>>, %arg7: memref<1x32x256xf32, #tpu.memory_space<vmem>>) attributes {dimension_semantics = [#tpu.dimension_semantics<parallel>, #tpu.dimension_semantics<parallel>], iteration_bounds = array<i64: 2, 1>, scalar_prefetch = 0 : i64, scratch_operands = 0 : i64, tpu.core_type = #tpu.core_type<tc>, window_params = [{transform_indices = @transform_0, window_bounds = array<i64: 1, 4, 256>}, {pipeline_mode = #tpu.pipeline_mode<synchronous>, transform_indices = @transform_1, window_bounds = array<i64: 4, 4>}, {pipeline_mode = #tpu.pipeline_mode<synchronous>, transform_indices = @transform_2, window_bounds = array<i64: 4, 1>}, {pipeline_mode = #tpu.pipeline_mode<synchronous>, transform_indices = @transform_3, window_bounds = array<i64: 32, 4>}, {pipeline_mode = #tpu.pipeline_mode<synchronous>, transform_indices = @transform_4, window_bounds = array<i64: 32, 1>}, {transform_indices = @transform_5, window_bounds = array<i64: 1, 32, 256>}]} {
    %c0 = arith.constant 0 : index
    %c0_0 = arith.constant 0 : index
    %c0_1 = arith.constant 0 : index
    %0 = vector.load %arg2[%c0, %c0_0, %c0_1] : memref<1x4x256xf32, #tpu.memory_space<vmem>>, vector<1x4x256xf32>
    %1 = vector.shape_cast %0 : vector<1x4x256xf32> to vector<4x256xf32>
    %c0_2 = arith.constant 0 : index
    %c0_3 = arith.constant 0 : index
    %2 = vector.load %arg3[%c0_2, %c0_3] : memref<4x4xf32, #tpu.memory_space<vmem>>, vector<4x4xf32>
    %cst = arith.constant dense<0.000000e+00> : vector<4x256xf32>
    %3 = tpu.matmul %2, %1, %cst {dimension_numbers = #tpu.dot_dimension_numbers<[1], [0], [0], [1], [0, 0, 1, 1], [], []>} : vector<4x4xf32>, vector<4x256xf32>, vector<4x256xf32> -> vector<4x256xf32>
    %c0_4 = arith.constant 0 : index
    %c0_5 = arith.constant 0 : index
    %4 = vector.load %arg4[%c0_4, %c0_5] : memref<4x1xf32, #tpu.memory_space<vmem>>, vector<4x1xf32>
    %5 = vector.broadcast %4 : vector<4x1xf32> to vector<4x256xf32>
    %6 = arith.addf %3, %5 : vector<4x256xf32>
    %cst_6 = arith.constant 0.000000e+00 : f32
    %7 = vector.broadcast %cst_6 : f32 to vector<4x256xf32>
    %8 = arith.maximumf %6, %7 : vector<4x256xf32>
    %c0_7 = arith.constant 0 : index
    %c0_8 = arith.constant 0 : index
    %9 = vector.load %arg5[%c0_7, %c0_8] : memref<32x4xf32, #tpu.memory_space<vmem>>, vector<32x4xf32>
    %cst_9 = arith.constant dense<0.000000e+00> : vector<32x256xf32>
    %10 = tpu.matmul %9, %8, %cst_9 {dimension_numbers = #tpu.dot_dimension_numbers<[1], [0], [0], [1], [0, 0, 1, 1], [], []>} : vector<32x4xf32>, vector<4x256xf32>, vector<32x256xf32> -> vector<32x256xf32>
    %c0_10 = arith.constant 0 : index
    %c0_11 = arith.constant 0 : index
    %11 = vector.load %arg6[%c0_10, %c0_11] : memref<32x1xf32, #tpu.memory_space<vmem>>, vector<32x1xf32>
    %12 = vector.broadcast %11 : vector<32x1xf32> to vector<32x256xf32>
    %13 = arith.addf %10, %12 : vector<32x256xf32>
    %14 = arith.mulf %13, %13 : vector<32x256xf32>
    %cst_12 = arith.constant dense<0.000000e+00> : vector<256xf32>
    %15 = vector.multi_reduction <add>, %14, %cst_12 [0] : vector<32x256xf32> to vector<256xf32>
    %16 = vector.shape_cast %15 : vector<256xf32> to vector<1x256xf32>
    %cst_13 = arith.constant 1.000000e-24 : f32
    %17 = vector.broadcast %cst_13 : f32 to vector<1x256xf32>
    %18 = arith.maximumf %16, %17 : vector<1x256xf32>
    %19 = math.rsqrt %18 : vector<1x256xf32>
    %20 = vector.broadcast %19 : vector<1x256xf32> to vector<32x256xf32>
    %21 = arith.mulf %13, %20 : vector<32x256xf32>
    %c0_14 = arith.constant 0 : index
    %c0_15 = arith.constant 0 : index
    %c0_16 = arith.constant 0 : index
    %22 = vector.load %arg7[%c0_14, %c0_15, %c0_16] : memref<1x32x256xf32, #tpu.memory_space<vmem>>, vector<1x32x256xf32>
    %23 = vector.shape_cast %22 : vector<1x32x256xf32> to vector<32x256xf32>
    %24 = vector.shape_cast %21 : vector<32x256xf32> to vector<1x32x256xf32>
    tpu.vector_store %arg7[%c0_14, %c0_15, %c0_16], %24 {strides = array<i32>} : memref<1x32x256xf32, #tpu.memory_space<vmem>>, vector<1x32x256xf32>,
    return
  }
  func.func @transform_0(%arg0: i32, %arg1: i32) -> (i32, i32, i32) {
    %c0_i32 = arith.constant 0 : i32
    %c0_i32_0 = arith.constant 0 : i32
    return %arg0, %c0_i32, %arg1 : i32, i32, i32
  }
  func.func @transform_1(%arg0: i32, %arg1: i32) -> (i32, i32) {
    %c0_i32 = arith.constant 0 : i32
    %c0_i32_0 = arith.constant 0 : i32
    %c0_i32_1 = arith.constant 0 : i32
    return %c0_i32, %c0_i32_0 : i32, i32
  }
  func.func @transform_2(%arg0: i32, %arg1: i32) -> (i32, i32) {
    %c0_i32 = arith.constant 0 : i32
    %c0_i32_0 = arith.constant 0 : i32
    %c0_i32_1 = arith.constant 0 : i32
    return %c0_i32, %c0_i32_0 : i32, i32
  }
  func.func @transform_3(%arg0: i32, %arg1: i32) -> (i32, i32) {
    %c0_i32 = arith.constant 0 : i32
    %c0_i32_0 = arith.constant 0 : i32
    %c0_i32_1 = arith.constant 0 : i32
    return %c0_i32, %c0_i32_0 : i32, i32
  }
  func.func @transform_4(%arg0: i32, %arg1: i32) -> (i32, i32) {
    %c0_i32 = arith.constant 0 : i32
    %c0_i32_0 = arith.constant 0 : i32
    %c0_i32_1 = arith.constant 0 : i32
    return %c0_i32, %c0_i32_0 : i32, i32
  }
  func.func @transform_5(%arg0: i32, %arg1: i32) -> (i32, i32, i32) {
    %c0_i32 = arith.constant 0 : i32
    %c0_i32_0 = arith.constant 0 : i32
    return %arg0, %c0_i32, %arg1 : i32, i32, i32
  }
}

</mosaic_0001>

<bundles_post_ra>
// kernel: projection_head.1
= control target key start
LH: loop header
LB: loop body
LE: loop exit
PB: predicated region body
PF: predicated region fallthrough
CT: control target
= control target key end

     0   :  { %s737_s18 = smov 0   ;;  %s739_s19 = smov 0   ;;  %s815_s0 = inlined_call_operand.vmem [shape: f32[2,4,256], index: 0, kind: input, shape index: {}]   ;;  %s816_s1 = inlined_call_operand.vmem [shape: f32[4,4], index: 1, kind: input, shape index: {}]   ;;  %s817_s2 = inlined_call_operand.vmem [shape: f32[4,1], index: 2, kind: input, shape index: {}]   ;;  %s818_s3 = inlined_call_operand.vmem [shape: f32[32,4], index: 3, kind: input, shape index: {}]   ;;  %s819_s4 = inlined_call_operand.vmem [shape: f32[32,1], index: 4, kind: input, shape index: {}]   ;;  %s820_s5 = inlined_call_operand.vmem [shape: f32[2,32,256], index: 5, kind: output, shape index: {}]  }
   0x1   :  { %s741_s20 = smov 0  }
   0x2 LB: > { %s27_s21 = sadd.s32 1, %s699_s19  ;;  %p628_p0 = scmp.ge.s32.totalorder %s703_s20, 1  ;;  %s703_s20 = sphi %s741_s20, %s15_s20   ;;  %s699_s19 = sphi %s739_s19, %s822_s19   ;;  %s695_s18 = sphi %s737_s18, %s821_s18  }
   0x3   : > { %p29_p1 = scmp.ge.s32.totalorder %s27_s21, 2  ;;  %p208_p2 = scmp.lt.s32.totalorder %s703_s20, 3 }
   0x5   : > { %s824_s21 = smov (%p29_p1, %s27_s21), 0  ;;  %p209_p3 = pnand %p628_p0, %p208_p2 }
   0x6   : > { %p245_p4 = scmp.lt.s32.totalorder (!%p209_p3), %s695_s18, 1  ;;  %v705_v0 = vmov (!%p209_p3), 0.0   ;;  %v266_v1 = vld [vmem:[%s817_s2] sm:$0xf] (!%p209_p3)  ;;  %v706_v2 = vmov (!%p209_p3), 0   ;;  %vm278_vm0 = vcmask (!%p209_p3), 1043456  }
   0x7   : > { %212 = sbr.rel (%p209_p3) target bundleno = 498 (0x1f2), region = 40  ;;  %347 = vmatprep.mubr.f32.mxu0 (!%p209_p3), %v705_v0  ;;  %472 = vmatprep.mubr.f32.mxu1 (!%p209_p3), %v705_v0  ;;  %v360_v3 = vld [vmem:[%s819_s4] sm:$0xff] (!%p209_p3)  ;;  %vm274_vm1 = vcmask (!%p209_p3), 31744   ;;  %v363_v7 = vld [vmem:[%s819_s4 + $0x18] sm:$0xff] (!%p209_p3)  ;;  %v361_v8 = vld [vmem:[%s819_s4 + $0x8] sm:$0xff] (!%p209_p3) }
   0x8   : > { %674 = vset.pattern.permute.xlu0 (!%p209_p3), %v706_v2  ;;  %675 = vset.pattern.permute.xlu1 (!%p209_p3), %v706_v2  ;;  %v265_v6 = vld [vmem:[%s816_s1] sm:$0xf] (!%p209_p3)  ;;  %v362_v9 = vld [vmem:[%s819_s4 + $0x10] sm:$0xff] (!%p209_p3)  ;;  %v357_v18 = vld [vmem:[%s818_s3 + $0x8] sm:$0xff] (!%p209_p3) }
   0x9   : > { %269 = vperm.xlu0 (!%p209_p3), %674, %v266_v1   ;;  %371 = vperm.xlu1 (!%p209_p3), %675, %v361_v8   ;;  %v356_v17 = vld [vmem:[%s818_s3] sm:$0xff] (!%p209_p3)  ;;  %v358_v19 = vld [vmem:[%s818_s3 + $0x10] sm:$0xff] (!%p209_p3)  ;;  %v359_v20 = vld [vmem:[%s818_s3 + $0x18] sm:$0xff] (!%p209_p3) }
   0xd   : > { %366 = vperm.xlu0 (!%p209_p3), %674, %v360_v3   ;;  %376 = vperm.xlu1 (!%p209_p3), %675, %v362_v9  }
   0xe   : > { %s826_s18 = smov (!%p245_p4, %s695_s18), 1 }
   0xf   : > { %s644_s24 = sshll.u32 %s826_s18, 3  ;;  %s645_s25 = sshll.u32 %s826_s18, 6 }
  0x10   : > { %s252_s29 = scalar_lea.vmem %s815_s0, %s644_s24  ;;  %s262_s28 = scalar_lea.vmem %s820_s5, %s645_s25 }
  0x11   : > { %v264_v4 = vld [vmem:[%s252_s29] sm:$0xff]  ;;  %381 = vperm.xlu0 %674, %v363_v7  }
  0x12   : > { %v273_v5 = vcombine.high %v264_v4, %v264_v4 }
  0x14   : > { %633 = vmatprep.subr.msk.mxu0 %vm278_vm0, %v273_v5 }
  0x15   : > { %634 = vmatpush1.msk.msra.mxu0 %vm278_vm0, %v264_v4 }
  0x16   : > { %635 = vmatmul.mubr.msk.f32.vlgmr.msra.gmra.mrb[0].mxu0 %vm274_vm1, %v265_v6 }
  0x17   : > { %466 = vmatprep.mubr.f32.mxu0 %v705_v0 }
  0x88   : > { %v270_v10 = vpop.permute.xlu0 %269  ;;  %v372_v21 = vpop.permute.xlu1 %371 }
  0x8c   : > { %v367_v22 = vpop.permute.xlu0 %366  ;;  %v377_v31 = vpop.permute.xlu1 %376 }
  0x90   : > { %v382_v43 = vpop.permute.xlu0 %381 }
  0xe9   : > { %v349_v11 = vpop.f32.mrb[0].mxu0 }
  0xea   : > { %v350_v12 = vadd.f32 %v349_v11, %v270_v10  ;;  %v351_v13 = vpop.f32.mrb[1].mxu0 }
  0xeb   : > { %v352_v14 = vadd.f32 %v351_v13, %v270_v10 }
  0xec   : > { %v354_v16 = vmax.f32 %v350_v12, 0.0 }
  0xed   : > { %v355_v15 = vmax.f32 %v352_v14, 0.0 }
  0xef   : > { %636 = vmatprep.subr.msk.mxu0 %vm278_vm0, %v355_v15  ;;  %646 = vmatprep.subr.msk.mxu1 %vm278_vm0, %v355_v15 }
  0xf0   : > { %637 = vmatpush1.msk.msra.mxu0 %vm278_vm0, %v354_v16  ;;  %647 = vmatpush1.msk.msra.mxu1 %vm278_vm0, %v354_v16 }
  0xf1   : > { %638 = vmatmul.mubr.msk.f32.vlgmr.msra.gmra.mrb[2].mxu0 %vm274_vm1, %v356_v17  ;;  %639 = vmatmul.mubr.msk.f32.vlgmr.msra.gmra.mrb[0].mxu1 %vm274_vm1, %v357_v18 }
  0xf2   : > { %478 = vmatprep.mubr.f32.mxu1 %v705_v0 }
  0xf5   : > { %640 = vmatmul.mubr.msk.f32.gmra.mrb[2].mxu1 %vm274_vm1, %v358_v19 }
  0xf6   : > { %484 = vmatprep.mubr.f32.mxu1 %v705_v0 }
  0xf9   : > { %641 = vmatmul.mubr.msk.f32.gmra.mrb[4].mxu1 %vm274_vm1, %v359_v20 }
 0x1c4   : > { %v468_v23 = vpop.f32.mrb[2].mxu0  ;;  %v474_v24 = vpop.f32.mrb[0].mxu1 }
 0x1c5   : > { %v469_v25 = vadd.f32 %v468_v23, %v367_v22  ;;  %v475_v26 = vadd.f32 %v474_v24, %v372_v21  ;;  %v470_v27 = vpop.f32.mrb[3].mxu0  ;;  %v476_v28 = vpop.f32.mrb[1].mxu1 }
 0x1c6   : > { %v471_v29 = vadd.f32 %v470_v27, %v367_v22  ;;  %v477_v30 = vadd.f32 %v476_v28, %v372_v21 }
 0x1c7   : > { %v491_v32 = vmul.f32 %v469_v25, %v469_v25  ;;  %v493_v33 = vmul.f32 %v475_v26, %v475_v26 }
 0x1c8   : > { %v492_v34 = vmul.f32 %v471_v29, %v471_v29  ;;  %v494_v35 = vmul.f32 %v477_v30, %v477_v30  ;;  %v480_v36 = vpop.f32.mrb[2].mxu1 }
 0x1c9   : > { %v499_v37 = vadd.f32 %v493_v33, %v491_v32  ;;  %v481_v38 = vadd.f32 %v480_v36, %v377_v31  ;;  %v482_v39 = vpop.f32.mrb[3].mxu1 }
 0x1ca   : > { %v508_v40 = vadd.f32 %v494_v35, %v492_v34  ;;  %v483_v41 = vadd.f32 %v482_v39, %v377_v31 }
 0x1cb   : > { %v495_v42 = vmul.f32 %v481_v38, %v481_v38 }
 0x1cc   : > { %v496_v44 = vmul.f32 %v483_v41, %v483_v41  ;;  %v486_v45 = vpop.f32.mrb[4].mxu1 }
 0x1cd   : > { %v500_v46 = vadd.f32 %v499_v37, %v495_v42  ;;  %v487_v47 = vadd.f32 %v486_v45, %v382_v43  ;;  %v488_v48 = vpop.f32.mrb[5].mxu1 }
 0x1ce   : > { %v509_v49 = vadd.f32 %v508_v40, %v496_v44  ;;  %v489_v50 = vadd.f32 %v488_v48, %v382_v43 }
 0x1cf   : > { %v497_v51 = vmul.f32 %v487_v47, %v487_v47 }
 0x1d0   : > { %v498_v52 = vmul.f32 %v489_v50, %v489_v50 }
 0x1d1   : > { %v501_v53 = vadd.f32 %v500_v46, %v497_v51 }
 0x1d2   : > { %v510_v54 = vadd.f32 %v509_v49, %v498_v52 }
 0x1d3   : > { %v502_v55 = vrot.slane %v501_v53, 4 }
 0x1d4   : > { %v511_v56 = vrot.slane %v510_v54, 4 }
 0x1d5   : > { %v503_v57 = vadd.f32 %v502_v55, %v501_v53 }
 0x1d6   : > { %v512_v58 = vadd.f32 %v511_v56, %v510_v54 }
 0x1d7   : > { %v504_v59 = vrot.slane %v503_v57, 2 }
 0x1d8   : > { %v513_v60 = vrot.slane %v512_v58, 2 }
 0x1d9   : > { %v505_v61 = vadd.f32 %v504_v59, %v503_v57 }
 0x1da   : > { %v514_v62 = vadd.f32 %v513_v60, %v512_v58 }
 0x1db   : > { %v506_v63 = vrot.slane %v505_v61, 1 }
 0x1dc   : > { %v515_v0 = vrot.slane %v514_v62, 1 }
 0x1dd   : > { %v507_v1 = vadd.f32 %v506_v63, %v505_v61 }
 0x1de   : > { %v516_v2 = vadd.f32 %v515_v0, %v514_v62 }
 0x1df   : > { %v517_v3 = vmax.f32 %v507_v1, 1e-24 }
 0x1e0   : > { %v518_v4 = vmax.f32 %v516_v2, 1e-24 }
 0x1e1   : > { %677 = vrsqrt.f32 %v517_v3 }
 0x1e2   : > { %679 = vrsqrt.f32 %v518_v4 }
 0x1eb   : > { %v678_v5 = vpop.eup %677 }
 0x1ec   : > { %v680_v6 = vpop.eup %679  ;;  %v521_v7 = vmul.f32 %v678_v5, %v469_v25  ;;  %v523_v8 = vmul.f32 %v678_v5, %v475_v26  ;;  %v525_v9 = vmul.f32 %v678_v5, %v481_v38  ;;  %v527_v10 = vmul.f32 %v678_v5, %v487_v47 }
 0x1ed   : > { %v522_v11 = vmul.f32 %v680_v6, %v471_v29  ;;  %v524_v12 = vmul.f32 %v680_v6, %v477_v30  ;;  %v526_v13 = vmul.f32 %v680_v6, %v483_v41  ;;  %v528_v14 = vmul.f32 %v680_v6, %v489_v50 }
 0x1ee   : > { %529 = vst [vmem:[%s262_s28] sm:$0xff] %v521_v7  ;;  %531 = vst [vmem:[%s262_s28 + $0x10] sm:$0xff] %v523_v8 }
 0x1ef   : > { %533 = vst [vmem:[%s262_s28 + $0x20] sm:$0xff] %v525_v9  ;;  %535 = vst [vmem:[%s262_s28 + $0x30] sm:$0xff] %v527_v10 }
 0x1f0   : > { %530 = vst [vmem:[%s262_s28 + $0x8] sm:$0xff] %v522_v11  ;;  %532 = vst [vmem:[%s262_s28 + $0x18] sm:$0xff] %v524_v12 }
 0x1f1   : > { %534 = vst [vmem:[%s262_s28 + $0x28] sm:$0xff] %v526_v13  ;;  %536 = vst [vmem:[%s262_s28 + $0x38] sm:$0xff] %v528_v14 }
 0x1f2 PF: > { %s15_s20 = sadd.s32 1, %s703_s20   ;;  %s821_s18 = smov %s699_s19 }
 0x1f3   : > { %p12_p5 = scmp.ge.s32.totalorder %s15_s20, 4   ;;  %s822_s19 = smov %s824_s21 }
 0x1f5   :  { %14 = sbr.rel (!%p12_p5) target bundleno = 2 (0x2), region = 70 }

</bundles_post_ra>
